<compile_context>
chip_gen: v5e
topology: v5e:2x2
jax: 0.10.0
libtpu: 0.0.40
codegen_flags: <defaults>
</compile_context>

<pallas_src>
import functools

import jax
import jax.numpy as jnp
from jax.experimental import pallas as pl
from jax.experimental.pallas import tpu as pltpu

_MIB = 1024 * 1024


def _round_up(v, m):
    return (v + m - 1) // m * m


def _sublane_pack(itemsize):
    # rows per sublane pack: f32 -> 8, bf16 -> 16, int8/fp8 -> 32
    return {4: 8, 2: 16, 1: 32}.get(int(itemsize), 8)


def _vmem_caps():
    """(planning budget, hard vmem_limit cap) for this TPU generation."""
    try:
        cap = int(pltpu.get_tpu_info().vmem_capacity_bytes)
    except Exception:  # unknown target / interpret mode
        cap = 64 * _MIB
    plan_budget = int(cap * 0.6)                       # ~38 MiB v7x, ~77 MiB v5e/v6e
    hard_cap = min(int(cap * 0.85), cap - 8 * _MIB)    # leave compiler headroom
    return plan_budget, hard_cap


def _choose_row_tile(m_rows, h, x_item, w_item, budget):
    """Row tile TM for the weight-resident fast path, or None if W can't stay resident."""
    sub = _sublane_pack(x_item)
    fixed = h * h * w_item + h * w_item          # W + bias, single-buffered
    per_row = 4 * h * x_item                     # 2 bufs x (x tile + out tile)
    if budget - fixed < per_row * sub:
        return None                              # -> column-tiled path
    tm_fit = (budget - fixed) // per_row
    tm_target = max(512, (2 * _MIB) // max(h * x_item, 1))   # aim for ~2 MiB x tiles
    tm = min(tm_fit, tm_target, _round_up(m_rows, sub))
    tm = max(sub, (tm // sub) * sub)
    # Keep at least 2 row tiles when tiles stay >= ~1 MiB, so the "parallel"
    # row axis can shard across both TensorCores on v7x (harmless on v5e/v6e).
    if tm >= m_rows and m_rows > 2 * sub:
        half = _round_up(pl.cdiv(m_rows, 2), sub)
        if half * h * x_item >= _MIB:
            tm = half
    return tm


def _choose_col_tiles(m_rows, h, x_item, w_item, budget):
    """(TM, TN) for the column-tiled (large-H) path."""
    sub = _sublane_pack(x_item)
    tn = 512 if h >= 4096 else (256 if h >= 1024 else 128)
    tn = min(tn, _round_up(h, 128))
    w_stream = 2 * tn * (h + 1) * w_item                 # streamed W + bias tiles (dbuf)
    per_row = 2 * h * x_item + 4 * tn * x_item           # x full (dbuf) + residual/out tiles
    avail = max(budget - w_stream, per_row * sub)
    tm_fit = avail // per_row
    tm_target = max(sub, (2 * _MIB) // max(h * x_item, 1))
    tm = min(tm_fit, tm_target, _round_up(m_rows, sub))
    tm = max(sub, (tm // sub) * sub)
    return tm, tn


def _const_spec(shape):
    """BlockSpec for a grid-constant operand: VMEM-resident, single-buffered."""
    try:
        return pl.BlockSpec(shape, lambda i: (0, 0), pipeline_mode=pl.Buffered(1))
    except TypeError:  # older jax without pipeline_mode kwarg
        return pl.BlockSpec(shape, lambda i: (0, 0))


def _resident_w_kernel(x_ref, w_ref, b_ref, o_ref):
    """One row tile: o = x @ W + b + x (f32 MXU accumulation, fused residual)."""
    x = x_ref[...]
    y = jnp.dot(x, w_ref[...], preferred_element_type=jnp.float32)
    y = y + b_ref[...].astype(jnp.float32)
    o_ref[...] = (y + x.astype(jnp.float32)).astype(o_ref.dtype)


def _col_tiled_kernel(x_ref, xres_ref, w_ref, b_ref, o_ref):
    """One (row, col) tile: o[:, j] = x @ W[:, j] + b[j] + x[:, j]."""
    y = jnp.dot(x_ref[...], w_ref[...], preferred_element_type=jnp.float32)
    y = y + b_ref[...].astype(jnp.float32)
    o_ref[...] = (y + xres_ref[...].astype(jnp.float32)).astype(o_ref.dtype)


@functools.partial(jax.jit, static_argnames=("force_col_tiling", "use_bf16"))
def residual_add(x, w, b, *, force_col_tiling=False, use_bf16=False):
    """x: (B, S, H), w: (H, H), b: (H,). Returns Linear(x) + x, same shape/dtype as x."""
    B, S, H = x.shape
    M = B * S

    x2d = x.reshape(M, H)
    b2d = b.reshape(1, H)
    if use_bf16:
        # MXU-native bf16 inputs with f32 accumulation (deviates from PyTorch f32 numerics).
        x2d = x2d.astype(jnp.bfloat16)
        w = w.astype(jnp.bfloat16)

    x_item = jnp.dtype(x2d.dtype).itemsize
    w_item = jnp.dtype(w.dtype).itemsize
    budget, hard_cap = _vmem_caps()

    tm = None if force_col_tiling else _choose_row_tile(M, H, x_item, w_item, budget)

    if tm is not None:
        # --- Fast path: weight resident in VMEM, 1-D grid over streamed row tiles. ---
        grid = (pl.cdiv(M, tm),)
        vmem_need = 4 * tm * H * x_item + (H * H + H) * w_item
        cost = pl.CostEstimate(
            flops=2 * M * H * H,
            transcendentals=0,
            bytes_accessed=(2 * M * H) * x_item + (H * H + H) * w_item,
        )
        out = pl.pallas_call(
            _resident_w_kernel,
            out_shape=jax.ShapeDtypeStruct((M, H), x.dtype),
            grid=grid,
            in_specs=[
                pl.BlockSpec((tm, H), lambda i: (i, 0)),   # activations: streamed
                _const_spec((H, H)),                       # weight: resident, 1 buffer
                _const_spec((1, H)),                       # bias:  resident, 1 buffer
            ],
            out_specs=pl.BlockSpec((tm, H), lambda i: (i, 0)),
            compiler_params=pltpu.CompilerParams(
                dimension_semantics=("parallel",),   # v7x: shard row tiles over both TCs
                vmem_limit_bytes=int(min(hard_cap, max(32 * _MIB, vmem_need + 8 * _MIB))),
            ),
            cost_estimate=cost,
        )(x2d, w, b2d)
    else:
        # --- Large-H path: W no longer VMEM-resident; stream (H, TN) column tiles of
        #     W/bias over the inner grid axis, take the residual from a second
        #     (TM, TN) view of x, write output per (i, j) tile.
        tm, tn = _choose_col_tiles(M, H, x_item, w_item, budget)
        grid = (pl.cdiv(M, tm), pl.cdiv(H, tn))
        vmem_need = (2 * tm * H + 4 * tm * tn) * x_item + 2 * tn * (H + 1) * w_item
        cost = pl.CostEstimate(
            flops=2 * M * H * H,
            transcendentals=0,
            bytes_accessed=(3 * M * H) * x_item + grid[0] * (H * H + H) * w_item,
        )
        out = pl.pallas_call(
            _col_tiled_kernel,
            out_shape=jax.ShapeDtypeStruct((M, H), x.dtype),
            grid=grid,
            in_specs=[
                pl.BlockSpec((tm, H), lambda i, j: (i, 0)),    # x (full K) for the matmul
                pl.BlockSpec((tm, tn), lambda i, j: (i, j)),   # x column tile (residual)
                pl.BlockSpec((H, tn), lambda i, j: (0, j)),    # W column tile: streamed
                pl.BlockSpec((1, tn), lambda i, j: (0, j)),    # bias column tile
            ],
            out_specs=pl.BlockSpec((tm, tn), lambda i, j: (i, j)),
            compiler_params=pltpu.CompilerParams(
                dimension_semantics=("parallel", "arbitrary"),
                vmem_limit_bytes=int(min(hard_cap, max(32 * _MIB, vmem_need + 8 * _MIB))),
            ),
            cost_estimate=cost,
        )(x2d, x2d, w, b2d)

    return out.reshape(B, S, H)


if __name__ == "__main__":
    key = jax.random.PRNGKey(0)
    kx, kw, kb = jax.random.split(key, 3)

    # Small shapes implied by ResidualAdd wrapping a Linear(H -> H): (B, S, H).
    B, S, H = 2, 8, 32
    x = jax.random.normal(kx, (B, S, H), dtype=jnp.float32)
    w = jax.random.normal(kw, (H, H), dtype=jnp.float32) * 0.02
    b = jax.random.normal(kb, (H,), dtype=jnp.float32) * 0.02

    out = jax.block_until_ready(residual_add(x, w, b))
    ref = (x.reshape(B * S, H) @ w + b).reshape(B, S, H) + x
    assert out.shape == x.shape and out.dtype == x.dtype
    # tolerance covers TPU default matmul-precision differences between XLA and Mosaic
    assert jnp.allclose(out, ref, atol=2e-3, rtol=2e-3)

    # Exercise the column-tiled (large-H) path + ragged row-tile masking at small shapes.
    B2, S2, H2 = 2, 9, 256
    x2 = jax.random.normal(kx, (B2, S2, H2), dtype=jnp.float32)
    w2 = jax.random.normal(kw, (H2, H2), dtype=jnp.float32) * 0.02
    b2 = jax.random.normal(kb, (H2,), dtype=jnp.float32) * 0.02
    out2 = jax.block_until_ready(residual_add(x2, w2, b2, force_col_tiling=True))
    ref2 = (x2.reshape(B2 * S2, H2) @ w2 + b2).reshape(B2, S2, H2) + x2
    assert out2.shape == x2.shape and out2.dtype == x2.dtype
    assert jnp.allclose(out2, ref2, atol=5e-3, rtol=5e-3)

    print("KERNEL_OK")
</pallas_src>

<mosaic_0001>
module attributes {stable_mosaic.version = 11 : i64} {
  func.func @_resident_w_kernel(%arg0: i32, %arg1: memref<16x32xf32, #tpu.memory_space<vmem>>, %arg2: memref<32x32xf32, #tpu.memory_space<vmem>>, %arg3: memref<1x32xf32, #tpu.memory_space<vmem>>, %arg4: memref<16x32xf32, #tpu.memory_space<vmem>>) attributes {dimension_semantics = [#tpu.dimension_semantics<parallel>], iteration_bounds = array<i64: 1>, scalar_prefetch = 0 : i64, scratch_operands = 0 : i64, tpu.core_type = #tpu.core_type<tc>, window_params = [{transform_indices = @transform_0, window_bounds = array<i64: 16, 32>}, {pipeline_mode = #tpu.pipeline_mode<synchronous>, transform_indices = @transform_1, window_bounds = array<i64: 32, 32>}, {pipeline_mode = #tpu.pipeline_mode<synchronous>, transform_indices = @transform_2, window_bounds = array<i64: 1, 32>}, {transform_indices = @transform_3, window_bounds = array<i64: 16, 32>}]} {
    %c0 = arith.constant 0 : index
    %c0_0 = arith.constant 0 : index
    %0 = vector.load %arg1[%c0, %c0_0] : memref<16x32xf32, #tpu.memory_space<vmem>>, vector<16x32xf32>
    %c0_1 = arith.constant 0 : index
    %c0_2 = arith.constant 0 : index
    %1 = vector.load %arg2[%c0_1, %c0_2] : memref<32x32xf32, #tpu.memory_space<vmem>>, vector<32x32xf32>
    %cst = arith.constant dense<0.000000e+00> : vector<16x32xf32>
    %2 = tpu.matmul %0, %1, %cst {dimension_numbers = #tpu.dot_dimension_numbers<[1], [0], [0], [1], [0, 0, 1, 1], [], []>} : vector<16x32xf32>, vector<32x32xf32>, vector<16x32xf32> -> vector<16x32xf32>
    %c0_3 = arith.constant 0 : index
    %c0_4 = arith.constant 0 : index
    %3 = vector.load %arg3[%c0_3, %c0_4] : memref<1x32xf32, #tpu.memory_space<vmem>>, vector<1x32xf32>
    %4 = vector.broadcast %3 : vector<1x32xf32> to vector<16x32xf32>
    %5 = arith.addf %2, %4 : vector<16x32xf32>
    %6 = arith.addf %5, %0 : vector<16x32xf32>
    %c0_5 = arith.constant 0 : index
    %c0_6 = arith.constant 0 : index
    %7 = vector.load %arg4[%c0_5, %c0_6] : memref<16x32xf32, #tpu.memory_space<vmem>>, vector<16x32xf32>
    tpu.vector_store %arg4[%c0_5, %c0_6], %6 {strides = array<i32>} : memref<16x32xf32, #tpu.memory_space<vmem>>, vector<16x32xf32>,
    return
  }
  func.func @transform_0(%arg0: i32) -> (i32, i32) {
    %c0_i32 = arith.constant 0 : i32
    %c0_i32_0 = arith.constant 0 : i32
    return %arg0, %c0_i32 : i32, i32
  }
  func.func @transform_1(%arg0: i32) -> (i32, i32) {
    %c0_i32 = arith.constant 0 : i32
    %c0_i32_0 = arith.constant 0 : i32
    %c0_i32_1 = arith.constant 0 : i32
    return %c0_i32, %c0_i32_0 : i32, i32
  }
  func.func @transform_2(%arg0: i32) -> (i32, i32) {
    %c0_i32 = arith.constant 0 : i32
    %c0_i32_0 = arith.constant 0 : i32
    %c0_i32_1 = arith.constant 0 : i32
    return %c0_i32, %c0_i32_0 : i32, i32
  }
  func.func @transform_3(%arg0: i32) -> (i32, i32) {
    %c0_i32 = arith.constant 0 : i32
    %c0_i32_0 = arith.constant 0 : i32
    return %arg0, %c0_i32 : i32, i32
  }
}

</mosaic_0001>

<bundles_post_ra>
// kernel: residual_add.1
= control target key start
LH: loop header
LB: loop body
LE: loop exit
PB: predicated region body
PF: predicated region fallthrough
CT: control target
= control target key end

     0   :  { %8 = vsyncpa [#allocation3], 0  ;;  %s251_s0 = inlined_call_operand.hbm [shape: f32[16,32], index: 0, kind: input, shape index: {}]   ;;  %s252_s1 = inlined_call_operand.hbm [shape: f32[32,32], index: 1, kind: input, shape index: {}]   ;;  %s253_s2 = inlined_call_operand.vmem [shape: f32[1,32], index: 2, kind: input, shape index: {}]   ;;  %s254_s3 = inlined_call_operand.hbm [shape: f32[16,32], index: 3, kind: output, shape index: {}]  }
   0x1   :  { %9 = vsyncpa [#allocation6], 0 }
   0x2   :  { %10 = vsyncpa [#allocation4], 0  ;;  %s15_s14 = sshll.u32 %s251_s0, 4  ;;  %s201_s15 = smov [#allocation2]   ;;  %s16_s14 = int_to_ptr.hbm [resolvable:$true] %s15_s14 }
   0x3   :  { %s17_s16 = sshll.u32 %s201_s15, 4  ;;  %s28_s19 = sshll.u32 %s252_s1, 4  ;;  %s18_s16 = int_to_ptr.vmem [resolvable:$true] %s17_s16  ;;  %s29_s19 = int_to_ptr.hbm [resolvable:$true] %s28_s19 }
   0x4   :  { %s202_s20 = smov 128   ;;  %s203_s21 = smov 8  }
   0x5   :  { %23 = dma.hbm_to_vmem [thread:$0]  %s16_s14, 256, %s18_s16, [#allocation3], %s202_s20, %s202_s20, %s203_s21  }
   0x6   :  { %s204_s22 = smov [#allocation5]  }
   0x7   :  { %s30_s23 = sshll.u32 %s204_s22, 4  ;;  %s31_s23 = int_to_ptr.vmem [resolvable:$true] %s30_s23 }
   0x8   :  { %36 = dma.hbm_to_vmem [thread:$0]  %s29_s19, 512, %s31_s23, [#allocation6], %s202_s20, %s202_s20, %s203_s21  }
   0x9   :  { %195 = dma.done.wait [#allocation3], 256  }
   0xa   :  { %196 = vsyncadd [#allocation3], 4294967040 }
   0xb   :  { %197 = dma.done.wait [#allocation6], 512  }
   0xc   :  { %198 = vsyncadd [#allocation6], 4294966784  ;;  %v52_v0 = vld [vmem:[#allocation5 + $0x18] sm:$0xff]  ;;  %v51_v1 = vld [vmem:[#allocation5 + $0x10] sm:$0xff]  ;;  %vm57_vm0 = vcmask 261120   ;;  %s205_s24 = smov [#allocation7]  }
   0xd   :  { %76 = vmatpush.msra.mxu0 %v52_v0  ;;  %113 = vmatpush.msra.mxu1 %v52_v0  ;;  %v50_v2 = vld [vmem:[#allocation5 + $0x8] sm:$0xff]  ;;  %v49_v3 = vld [vmem:[#allocation5] sm:$0xff]  ;;  %v47_v4 = vld [vmem:[#allocation2] sm:$0xff]  ;;  %s95_s25 = sshll.u32 %s205_s24, 4  ;;  %s97_s28 = sshll.u32 %s254_s3, 4  ;;  %s96_s25 = int_to_ptr.vmem [resolvable:$true] %s95_s25  ;;  %s98_s28 = int_to_ptr.hbm [resolvable:$true] %s97_s28 }
   0xe   :  { %v48_v5 = vld [vmem:[#allocation2 + $0x8] sm:$0xff]  ;;  %v122_v6 = vld [vmem:[%s253_s2] ss:$0 sm:$0xff] }
   0xf   :  { %77 = vmatpush.msra.mxu0 %v51_v1  ;;  %114 = vmatpush.msra.mxu1 %v51_v1 }
  0x11   :  { %78 = vmatpush.msra.mxu0 %v50_v2  ;;  %115 = vmatpush.msra.mxu1 %v50_v2 }
  0x13   :  { %79 = vmatpush.msra.mxu0 %v49_v3  ;;  %116 = vmatpush.msra.mxu1 %v49_v3 }
  0x14   :  { %111 = vmatmul.msk.f32.vlgmr.msra.gmra.mxu0 %vm57_vm0, %v47_v4  ;;  %112 = vmatmul.msk.f32.vlgmr.msra.gmra.mxu1 %vm57_vm0, %v48_v5 }
  0x91   :  { %v81_v7 = vpop.f32.mrf.mxu0  ;;  %v84_v8 = vpop.f32.mrf.mxu1 }
  0x92   :  { %v82_v9 = vadd.f32 %v122_v6, %v81_v7  ;;  %v85_v10 = vadd.f32 %v122_v6, %v84_v8 }
  0x94   :  { %v87_v11 = vadd.f32 %v82_v9, %v47_v4  ;;  %v88_v12 = vadd.f32 %v85_v10, %v48_v5 }
  0x96   :  { %89 = vst.msk [vmem:[#allocation7] sm:$0xff] %vm57_vm0, %v87_v11 }
  0x97   :  { %90 = vst.msk [vmem:[#allocation7 + $0x8] sm:$0xff] %vm57_vm0, %v88_v12 }
  0x98   :  { %103 = dma.vmem_to_hbm [thread:$0]  %s96_s25, 256, %s98_s28, [#allocation4], %s202_s20, %s202_s20, %s203_s21  }
  0x99   :  { %199 = dma.done.wait [#allocation4], 256  }
  0x9a   :  { %200 = vsyncadd [#allocation4], 4294967040 }
  0x9b   :  { %108 = vsyncpa [#allocation3], 1 }
  0x9c   :  { %109 = vsyncpa [#allocation6], 1 }
  0x9d   :  { %110 = vsyncpa [#allocation4], 1 }

</bundles_post_ra>
